<compile_context>
chip_gen: v7x
topology: tpu7x:2x2x1
jax: 0.10.0
libtpu: 0.0.40
codegen_flags: <defaults>
</compile_context>

<pallas_src>
import functools
import math

import jax
import jax.numpy as jnp
from jax import lax
from jax.experimental import pallas as pl
from jax.experimental.pallas import tpu as pltpu


_NUM_SHARDS = 2                      # 2-way reduce sharding (both v7x TCs)
_FAST_PATH_F32_BYTES = 4 << 20       # fused path if f32 copy of x <= 4 MiB


# ---------------------------------------------------------------------------
# Fused single-pass kernel (whole x resident in VMEM)
# ---------------------------------------------------------------------------

def _fused_kernel(x_ref, o_ref, *, mode, scale, inv_n):
    x = x_ref[...].astype(jnp.float32)                        # [N, D]
    col_mean = jnp.sum(x, axis=0, keepdims=True) * inv_n      # [1, D]
    if mode == 'PN':
        xc = x - col_mean
        msq = jnp.sum(xc * xc) * inv_n
        o_ref[...] = (xc * (lax.rsqrt(1e-6 + msq) * scale)).astype(o_ref.dtype)
    elif mode == 'PN-SI':
        xc = x - col_mean
        inv = lax.rsqrt(1e-6 + jnp.sum(xc * xc, axis=1, keepdims=True)) * scale
        o_ref[...] = (xc * inv).astype(o_ref.dtype)
    else:  # 'PN-SCS'
        inv = lax.rsqrt(1e-6 + jnp.sum(x * x, axis=1, keepdims=True)) * scale
        o_ref[...] = (x * inv - col_mean).astype(o_ref.dtype)


# ---------------------------------------------------------------------------
# Pass 1: sharded reduction over nodes (col sums + per-column sum of squares)
# ---------------------------------------------------------------------------

def _reduce_kernel(x_ref, colsum_ref, colss_ref, *, n_total, tn, tiles_per_shard):
    c = pl.program_id(0)      # shard (parallel)
    i = pl.program_id(1)      # tile within shard (arbitrary / reduction)

    @pl.when(i == 0)
    def _():
        colsum_ref[...] = jnp.zeros_like(colsum_ref)
        colss_ref[...] = jnp.zeros_like(colss_ref)

    x = x_ref[...].astype(jnp.float32)                        # [TN, D]
    row_start = (c * tiles_per_shard + i) * tn
    rows = lax.broadcasted_iota(jnp.int32, x.shape, 0) + row_start
    x = jnp.where(rows < n_total, x, 0.0)                     # mask ragged tail

    s = jnp.sum(x, axis=0, keepdims=True)                     # [1, D]
    q = jnp.sum(x * x, axis=0, keepdims=True)                 # [1, D]
    colsum_ref[...] += s[None]                                 # [1, 1, D]
    colss_ref[...] += q[None]


# ---------------------------------------------------------------------------
# Pass 2: elementwise apply (one kernel per mode)
# ---------------------------------------------------------------------------

def _pn_apply_kernel(fac_ref, mf_ref, x_ref, o_ref):
    # out = x * factor - (col_mean * factor)
    x = x_ref[...].astype(jnp.float32)
    o_ref[...] = (x * fac_ref[...] - mf_ref[...]).astype(o_ref.dtype)


def _pn_si_apply_kernel(mean_ref, x_ref, o_ref, *, scale):
    # out = scale * (x - col_mean) / sqrt(1e-6 + ||x - col_mean||_row^2)
    x = x_ref[...].astype(jnp.float32)
    xc = x - mean_ref[...]
    inv = lax.rsqrt(1e-6 + jnp.sum(xc * xc, axis=1, keepdims=True)) * scale
    o_ref[...] = (xc * inv).astype(o_ref.dtype)


def _pn_scs_apply_kernel(mean_ref, x_ref, o_ref, *, scale):
    # out = scale * x / sqrt(1e-6 + ||x||_row^2) - col_mean
    x = x_ref[...].astype(jnp.float32)
    inv = lax.rsqrt(1e-6 + jnp.sum(x * x, axis=1, keepdims=True)) * scale
    o_ref[...] = (x * inv - mean_ref[...]).astype(o_ref.dtype)


# ---------------------------------------------------------------------------
# Sizing helpers
# ---------------------------------------------------------------------------

def _cdiv(a, b):
    return -(-a // b)


def _vmem_budget():
    """(vmem_limit_bytes, target tile bytes per buffer), generation-aware."""
    limit = 32 << 20                                     # safe on v7x (64 MiB phys)
    try:
        cap = int(getattr(pltpu.get_tpu_info(), "vmem_capacity_bytes", 0) or 0)
        if cap >= (96 << 20):                            # v5e / v6e: 128 MiB phys
            limit = 64 << 20
    except Exception:
        pass
    return limit, max(1 << 20, limit // 10)


def _sublane_multiple(itemsize):
    return max(8, 32 // max(1, itemsize))                # 8 f32, 16 bf16, 32 int8


def _choose_tile_rows(n_rows, row_bytes, sub, target_bytes):
    if n_rows <= sub:
        return n_rows                                    # single full block
    rows = max(sub, target_bytes // max(1, row_bytes))
    rows = min(rows, n_rows)
    return max(sub, (rows // sub) * sub)


def _sanitize_tile(tn, n_rows):
    tn = max(1, int(tn))
    if tn >= n_rows or n_rows <= 8:
        return n_rows
    return max(8, (min(tn, n_rows) // 8) * 8)


# ---------------------------------------------------------------------------
# Wrapper
# ---------------------------------------------------------------------------

def pair_norm(x, mode='PN', scale=1.0, tile_n=None, force_two_pass=False):
    """PairNorm forward. x: [N, D]."""
    assert mode in ['None', 'PN', 'PN-SI', 'PN-SCS']
    if mode == 'None':
        return x

    n, d = x.shape
    scale = float(scale)
    itemsize = x.dtype.itemsize
    sub = _sublane_multiple(itemsize)
    vmem_limit, target_bytes = _vmem_budget()

    # ---- Fast path: whole graph resident in VMEM, single fused pass --------
    if (not force_two_pass) and (n * d * 4 <= _FAST_PATH_F32_BYTES):
        return pl.pallas_call(
            functools.partial(_fused_kernel, mode=mode, scale=scale,
                              inv_n=1.0 / n),
            out_shape=jax.ShapeDtypeStruct((n, d), x.dtype),
            compiler_params=pltpu.CompilerParams(vmem_limit_bytes=vmem_limit),
        )(x)

    # ---- Pass 1: streaming reduction, sharded across TensorCores -----------
    if tile_n is not None:
        tn_r = _sanitize_tile(tile_n, n)
    else:
        tn_r = _choose_tile_rows(n, d * itemsize, sub, target_bytes)
    total_tiles = _cdiv(n, tn_r)
    tps = _cdiv(total_tiles, _NUM_SHARDS)
    last_tile = total_tiles - 1

    part_sum, part_ss = pl.pallas_call(
        functools.partial(_reduce_kernel, n_total=n, tn=tn_r,
                          tiles_per_shard=tps),
        out_shape=(jax.ShapeDtypeStruct((_NUM_SHARDS, 1, d), jnp.float32),
                   jax.ShapeDtypeStruct((_NUM_SHARDS, 1, d), jnp.float32)),
        grid=(_NUM_SHARDS, tps),
        in_specs=[pl.BlockSpec(
            (tn_r, d),
            lambda c, i, _t=tps, _l=last_tile: (jnp.minimum(c * _t + i, _l), 0))],
        out_specs=(pl.BlockSpec((1, 1, d), lambda c, i: (c, 0, 0)),
                   pl.BlockSpec((1, 1, d), lambda c, i: (c, 0, 0))),
        compiler_params=pltpu.CompilerParams(
            dimension_semantics=("parallel", "arbitrary"),
            vmem_limit_bytes=vmem_limit),
    )(x)

    col_mean = (jnp.sum(part_sum, axis=0) / n).astype(jnp.float32)   # [1, D]
    total_ss = jnp.sum(part_ss)                                       # scalar

    cparams_apply = pltpu.CompilerParams(
        dimension_semantics=("parallel",), vmem_limit_bytes=vmem_limit)

    # ---- Pass 2: elementwise apply, tiled + parallel over nodes ------------
    if mode == 'PN':
        # sum_i ||x_i - mu||^2 = sum_i ||x_i||^2 - N * ||mu||^2  (clamped)
        centered_ss = jnp.maximum(
            total_ss - n * jnp.sum(col_mean * col_mean), 0.0)
        factor = scale * lax.rsqrt(1e-6 + centered_ss / n)            # scalar
        fac = factor.reshape(1, 1).astype(jnp.float32)
        mf = (col_mean * factor).astype(jnp.float32)                  # [1, D]

        # Lane-dense view for small / odd D: [N, D] -> [N/k, k*D] (bitcast).
        xv, nv, dv = x, n, d
        if d % 128 != 0:
            k = 128 // math.gcd(d, 128)
            if k > 1 and n % k == 0:
                nv, dv = n // k, k * d
                xv = x.reshape(nv, dv)
                mf = jnp.tile(mf, (1, k))

        if tile_n is not None:
            tn_a = _sanitize_tile(tile_n, nv)
        else:
            tn_a = _choose_tile_rows(nv, dv * itemsize, sub, target_bytes)
        grid_a = _cdiv(nv, tn_a)

        out = pl.pallas_call(
            _pn_apply_kernel,
            out_shape=jax.ShapeDtypeStruct((nv, dv), x.dtype),
            grid=(grid_a,),
            in_specs=[pl.BlockSpec((1, 1), lambda i: (0, 0)),
                      pl.BlockSpec((1, dv), lambda i: (0, 0)),
                      pl.BlockSpec((tn_a, dv), lambda i: (i, 0))],
            out_specs=pl.BlockSpec((tn_a, dv), lambda i: (i, 0)),
            compiler_params=cparams_apply,
        )(fac, mf, xv)
        return out.reshape(n, d)

    # 'PN-SI' / 'PN-SCS' need row norms -> rows stay lane-contiguous.
    # TODO(synk): for D << 128 a segmented-lane row reduction could pack k rows
    # per vreg row; left as-is since tail rows are row-local and dropped.
    kernel = _pn_si_apply_kernel if mode == 'PN-SI' else _pn_scs_apply_kernel
    if tile_n is not None:
        tn_a = _sanitize_tile(tile_n, n)
    else:
        tn_a = _choose_tile_rows(n, d * itemsize, sub, target_bytes)
    grid_a = _cdiv(n, tn_a)

    out = pl.pallas_call(
        functools.partial(kernel, scale=scale),
        out_shape=jax.ShapeDtypeStruct((n, d), x.dtype),
        grid=(grid_a,),
        in_specs=[pl.BlockSpec((1, d), lambda i: (0, 0)),
                  pl.BlockSpec((tn_a, d), lambda i: (i, 0))],
        out_specs=pl.BlockSpec((tn_a, d), lambda i: (i, 0)),
        compiler_params=cparams_apply,
    )(col_mean, x)
    return out


# ---------------------------------------------------------------------------
# Pure-JAX reference (mirrors the PyTorch forward exactly)
# ---------------------------------------------------------------------------

def pair_norm_ref(x, mode='PN', scale=1.0):
    if mode == 'None':
        return x
    col_mean = x.mean(axis=0)
    if mode == 'PN':
        x = x - col_mean
        rownorm_mean = jnp.sqrt(1e-6 + jnp.mean(jnp.sum(x ** 2, axis=1)))
        x = scale * x / rownorm_mean
    if mode == 'PN-SI':
        x = x - col_mean
        rownorm_individual = jnp.sqrt(
            1e-6 + jnp.sum(x ** 2, axis=1, keepdims=True))
        x = scale * x / rownorm_individual
    if mode == 'PN-SCS':
        rownorm_individual = jnp.sqrt(
            1e-6 + jnp.sum(x ** 2, axis=1, keepdims=True))
        x = scale * x / rownorm_individual - col_mean
    return x


if __name__ == "__main__":
    key = jax.random.PRNGKey(0)
    ok = True

    # (shape, dtype, kwargs, tol)
    #  1) small f32  -> fused VMEM-resident fast path
    #  2) odd N & D  -> tiled path: masked tail, 2-shard reduce, lane-dense PN
    #  3) bf16       -> tiled path with dtype-aware tiles, D multiple of 128
    cases = [
        ((64, 32), jnp.float32, dict(), 1e-5),
        ((72, 48), jnp.float32, dict(force_two_pass=True, tile_n=16), 1e-5),
        ((200, 256), jnp.bfloat16, dict(force_two_pass=True), 2e-2),
    ]

    for (shape, dtype, kwargs, tol) in cases:
        key, sub = jax.random.split(key)
        x = jax.random.normal(sub, shape, dtype=jnp.float32).astype(dtype)
        xf = x.astype(jnp.float32)
        for mode in ['None', 'PN', 'PN-SI', 'PN-SCS']:
            out = jax.block_until_ready(
                pair_norm(x, mode=mode, scale=1.0, **kwargs))
            ref = pair_norm_ref(xf, mode=mode, scale=1.0)
            good = (out.shape == ref.shape) and bool(jnp.allclose(
                out.astype(jnp.float32), ref, atol=tol, rtol=tol))
            if not good:
                ok = False
                err = float(jnp.max(jnp.abs(out.astype(jnp.float32) - ref)))
                print(f"shape {shape} dtype {jnp.dtype(dtype).name} mode {mode}: "
                      f"MISMATCH, max err {err}")

    if ok:
        print("KERNEL_OK")
</pallas_src>

<mosaic_0001>
module attributes {stable_mosaic.version = 11 : i64} {
  func.func @_fused_kernel(%arg0: memref<64x32xf32, #tpu.memory_space<vmem>>, %arg1: memref<64x32xf32, #tpu.memory_space<vmem>>) attributes {dimension_semantics = [], scalar_prefetch = 0 : i64, scratch_operands = 0 : i64, tpu.core_type = #tpu.core_type<tc>} {
    %c0 = arith.constant 0 : index
    %c0_0 = arith.constant 0 : index
    %0 = vector.load %arg0[%c0, %c0_0] : memref<64x32xf32, #tpu.memory_space<vmem>>, vector<64x32xf32>
    %cst = arith.constant dense<0.000000e+00> : vector<32xf32>
    %1 = vector.multi_reduction <add>, %0, %cst [0] : vector<64x32xf32> to vector<32xf32>
    %2 = vector.shape_cast %1 : vector<32xf32> to vector<1x32xf32>
    %cst_1 = arith.constant 1.562500e-02 : f32
    %3 = vector.broadcast %cst_1 : f32 to vector<1x32xf32>
    %4 = arith.mulf %2, %3 : vector<1x32xf32>
    %5 = vector.broadcast %4 : vector<1x32xf32> to vector<64x32xf32>
    %6 = arith.subf %0, %5 : vector<64x32xf32>
    %7 = arith.mulf %6, %6 : vector<64x32xf32>
    %8 = vector.shape_cast %7 : vector<64x32xf32> to vector<1x64x32xf32>
    %cst_2 = arith.constant dense<0.000000e+00> : vector<1xf32>
    %9 = vector.multi_reduction <add>, %8, %cst_2 [1, 2] : vector<1x64x32xf32> to vector<1xf32>
    %10 = vector.shape_cast %9 : vector<1xf32> to vector<1x1x1xf32>
    %11 = vector.extract %10[0, 0, 0] : f32 from vector<1x1x1xf32>
    %cst_3 = arith.constant 1.562500e-02 : f32
    %12 = arith.mulf %11, %cst_3 : f32
    %cst_4 = arith.constant 9.99999997E-7 : f32
    %13 = arith.addf %cst_4, %12 : f32
    %14 = math.rsqrt %13 : f32
    %cst_5 = arith.constant 1.000000e+00 : f32
    %15 = arith.mulf %14, %cst_5 : f32
    %16 = vector.broadcast %15 : f32 to vector<64x32xf32>
    %17 = arith.mulf %6, %16 : vector<64x32xf32>
    %c0_6 = arith.constant 0 : index
    %c0_7 = arith.constant 0 : index
    %18 = vector.load %arg1[%c0_6, %c0_7] : memref<64x32xf32, #tpu.memory_space<vmem>>, vector<64x32xf32>
    tpu.vector_store %arg1[%c0_6, %c0_7], %17 {strides = array<i32>} : memref<64x32xf32, #tpu.memory_space<vmem>>, vector<64x32xf32>,
    return
  }
}

</mosaic_0001>

<bundles_post_ra>
// kernel: tpu_custom_call.1
= control target key start
LH: loop header
LB: loop body
LE: loop exit
PB: predicated region body
PF: predicated region fallthrough
CT: control target
= control target key end

     0   :  { %vm16_vm0 = vcmask 261120   ;;  %s193_s0 = inlined_call_operand.vmem [shape: f32[64,32], index: 0, kind: input, shape index: {}]   ;;  %s194_s1 = inlined_call_operand.vmem [shape: f32[64,32], index: 1, kind: output, shape index: {}]  }
   0x1   :  { %v8_v0 = vld [vmem:[%s193_s0] sm:$0xff]  ;;  %v9_v1 = vld [vmem:[%s193_s0 + $0x8] sm:$0xff]  ;;  %v10_v2 = vld [vmem:[%s193_s0 + $0x10] sm:$0xff] }
   0x2   :  { %v11_v3 = vld [vmem:[%s193_s0 + $0x18] sm:$0xff]  ;;  %v17_v4 = vsel %vm16_vm0, %v8_v0, 0.0  ;;  %v18_v5 = vsel %vm16_vm0, %v9_v1, 0.0  ;;  %v20_v6 = vsel %vm16_vm0, %v10_v2, 0.0  ;;  %v12_v7 = vld [vmem:[%s193_s0 + $0x20] sm:$0xff]  ;;  %v13_v10 = vld [vmem:[%s193_s0 + $0x28] sm:$0xff] }
   0x3   :  { %v19_v8 = vadd.f32 %v18_v5, %v17_v4  ;;  %v22_v9 = vsel %vm16_vm0, %v11_v3, 0.0  ;;  %v24_v12 = vsel %vm16_vm0, %v12_v7, 0.0  ;;  %v14_v13 = vld [vmem:[%s193_s0 + $0x30] sm:$0xff]  ;;  %v26_v15 = vsel %vm16_vm0, %v13_v10, 0.0  ;;  %v15_v16 = vld [vmem:[%s193_s0 + $0x38] sm:$0xff] }
   0x4   :  { %v28_v18 = vsel %vm16_vm0, %v14_v13, 0.0  ;;  %v30_v20 = vsel %vm16_vm0, %v15_v16, 0.0 }
   0x5   :  { %v21_v11 = vadd.f32 %v20_v6, %v19_v8 }
   0x7   :  { %v23_v14 = vadd.f32 %v22_v9, %v21_v11 }
   0x9   :  { %v25_v17 = vadd.f32 %v24_v12, %v23_v14 }
   0xb   :  { %v27_v19 = vadd.f32 %v26_v15, %v25_v17 }
   0xd   :  { %v29_v21 = vadd.f32 %v28_v18, %v27_v19 }
   0xf   :  { %v31_v22 = vadd.f32 %v30_v20, %v29_v21 }
  0x11   :  { %v32_v23 = vrot.slane %v31_v22, 4 }
  0x13   :  { %v33_v24 = vadd.f32 %v32_v23, %v31_v22 }
  0x15   :  { %v34_v25 = vrot.slane %v33_v24, 2 }
  0x17   :  { %v35_v26 = vadd.f32 %v34_v25, %v33_v24 }
  0x19   :  { %v36_v27 = vrot.slane %v35_v26, 1 }
  0x1b   :  { %v37_v28 = vadd.f32 %v36_v27, %v35_v26 }
  0x1d   :  { %v38_v29 = vmul.f32 0.015625, %v37_v28 }
  0x1f   :  { %v39_v30 = vsub.f32 %v8_v0, %v38_v29  ;;  %v40_v31 = vsub.f32 %v9_v1, %v38_v29  ;;  %v41_v32 = vsub.f32 %v10_v2, %v38_v29  ;;  %v42_v33 = vsub.f32 %v11_v3, %v38_v29 }
  0x20   :  { %v43_v34 = vsub.f32 %v12_v7, %v38_v29  ;;  %v44_v35 = vsub.f32 %v13_v10, %v38_v29  ;;  %v45_v40 = vsub.f32 %v14_v13, %v38_v29  ;;  %v46_v46 = vsub.f32 %v15_v16, %v38_v29 }
  0x21   :  { %v47_v36 = vmul.f32 %v39_v30, %v39_v30  ;;  %v48_v37 = vmul.f32 %v40_v31, %v40_v31  ;;  %v49_v38 = vmul.f32 %v41_v32, %v41_v32  ;;  %v50_v39 = vmul.f32 %v42_v33, %v42_v33 }
  0x22   :  { %v51_v41 = vmul.f32 %v43_v34, %v43_v34  ;;  %v52_v47 = vmul.f32 %v44_v35, %v44_v35  ;;  %v53_v50 = vmul.f32 %v45_v40, %v45_v40  ;;  %v54_v53 = vmul.f32 %v46_v46, %v46_v46 }
  0x23   :  { %v55_v42 = vsel %vm16_vm0, %v47_v36, 0.0  ;;  %v56_v43 = vsel %vm16_vm0, %v48_v37, 0.0  ;;  %v58_v44 = vsel %vm16_vm0, %v49_v38, 0.0  ;;  %v60_v48 = vsel %vm16_vm0, %v50_v39, 0.0 }
  0x24   :  { %v57_v45 = vadd.f32 %v56_v43, %v55_v42  ;;  %v62_v51 = vsel %vm16_vm0, %v51_v41, 0.0  ;;  %v64_v54 = vsel %vm16_vm0, %v52_v47, 0.0  ;;  %v66_v56 = vsel %vm16_vm0, %v53_v50, 0.0 }
  0x25   :  { %v68_v58 = vsel %vm16_vm0, %v54_v53, 0.0 }
  0x26   :  { %v59_v49 = vadd.f32 %v58_v44, %v57_v45 }
  0x28   :  { %v61_v52 = vadd.f32 %v60_v48, %v59_v49 }
  0x2a   :  { %v63_v55 = vadd.f32 %v62_v51, %v61_v52 }
  0x2c   :  { %v65_v57 = vadd.f32 %v64_v54, %v63_v55 }
  0x2e   :  { %v67_v59 = vadd.f32 %v66_v56, %v65_v57 }
  0x30   :  { %v69_v60 = vadd.f32 %v68_v58, %v67_v59 }
  0x32   :  { %70 = vadd.xlane.f32.xlu0 %v69_v60 }
  0xbf   :  { %v71_v61 = vpop.xlane.xlu0 %70 }
  0xc0   :  { %v72_v62 = vrot.slane %v71_v61, 4 }
  0xc2   :  { %v73_v63 = vadd.f32 %v72_v62, %v71_v61 }
  0xc4   :  { %v74_v0 = vrot.slane %v73_v63, 2 }
  0xc6   :  { %v75_v1 = vadd.f32 %v74_v0, %v73_v63 }
  0xc8   :  { %v76_v2 = vrot.slane %v75_v1, 1 }
  0xca   :  { %v77_v3 = vadd.f32 %v76_v2, %v75_v1 }
  0xcc   :  { %105 = vpush %v77_v3 }
  0xfd   :  { %s106_s0 = spop %105 }
  0xfe   :  { %s79_s22 = smul.f32 0.015625, %s106_s0 }
 0x100   :  { %s80_s23 = sadd.f32 1e-06, %s79_s22 }
 0x102   :  { %v81_v4 = vstv %s80_s23 }
 0x103   :  { %109 = vrsqrt.f32 %v81_v4 }
 0x10d   :  { %v110_v5 = vpop.eup %109 }
 0x10e   :  { %107 = vpush %v110_v5 }
 0x13f   :  { %s108_s24 = spop %107 }
 0x140   :  { %v84_v6 = vstv %s108_s24 }
 0x141   :  { %v85_v7 = vmul.f32 %v84_v6, %v39_v30  ;;  %v86_v8 = vmul.f32 %v84_v6, %v40_v31  ;;  %v87_v9 = vmul.f32 %v84_v6, %v41_v32  ;;  %v88_v10 = vmul.f32 %v84_v6, %v42_v33 }
 0x142   :  { %v89_v11 = vmul.f32 %v84_v6, %v43_v34  ;;  %v90_v12 = vmul.f32 %v84_v6, %v44_v35  ;;  %v91_v13 = vmul.f32 %v84_v6, %v45_v40  ;;  %v92_v14 = vmul.f32 %v84_v6, %v46_v46 }
 0x143   :  { %93 = vst.msk [vmem:[%s194_s1] sm:$0xff] %vm16_vm0, %v85_v7  ;;  %94 = vst.msk [vmem:[%s194_s1 + $0x8] sm:$0xff] %vm16_vm0, %v86_v8 }
 0x144   :  { %95 = vst.msk [vmem:[%s194_s1 + $0x10] sm:$0xff] %vm16_vm0, %v87_v9  ;;  %96 = vst.msk [vmem:[%s194_s1 + $0x18] sm:$0xff] %vm16_vm0, %v88_v10 }
 0x145   :  { %97 = vst.msk [vmem:[%s194_s1 + $0x20] sm:$0xff] %vm16_vm0, %v89_v11  ;;  %98 = vst.msk [vmem:[%s194_s1 + $0x28] sm:$0xff] %vm16_vm0, %v90_v12 }
 0x146   :  { %99 = vst.msk [vmem:[%s194_s1 + $0x30] sm:$0xff] %vm16_vm0, %v91_v13  ;;  %100 = vst.msk [vmem:[%s194_s1 + $0x38] sm:$0xff] %vm16_vm0, %v92_v14 }

</bundles_post_ra>
